<compile_context>
chip_gen: v7x
topology: tpu7x:2x2x1
jax: 0.10.0
libtpu: 0.0.40
codegen_flags: <defaults>
</compile_context>

<pallas_src>
import functools

import jax
import jax.numpy as jnp
import numpy as np
from jax.experimental import pallas as pl
from jax.experimental.pallas import tpu as pltpu


def _round_up(v, m):
    return -(-v // m) * m


# ----------------------------- Pallas kernel --------------------------------
def timeconv_kernel(x_ref, cop_ref, o_ref):
    """x_ref: (T*Cin, tile); cop_ref: (T*Cout, T*Cin) with residual identity
    folded in; o_ref: (T*Cout, tile).  One HIGHEST-precision MXU matmul."""
    o_ref[...] = jnp.dot(
        cop_ref[...], x_ref[...],
        preferred_element_type=jnp.float32,
        precision=jax.lax.Precision.HIGHEST)


# --------------------------- operator construction ---------------------------
def build_composed_operator(weights, T, *, fold_residual=True):
    """weights: (Cin, Cout, M, 2) float32. Returns C_op: (T*Cout, T*Cin)."""
    Cin, Cout, M, _ = weights.shape
    assert M <= T // 2 + 1, "modes must be <= T//2+1 (rfft length)"
    if fold_residual:
        assert Cin == Cout, "residual fold (x + h) requires in_ch == out_ch"

    t = jnp.arange(T, dtype=jnp.float32)
    m = jnp.arange(M, dtype=jnp.float32)
    theta = 2.0 * jnp.pi * m[:, None] * t[None, :] / T                 # (M, T)
    fcos = jnp.cos(theta)                                              # (M, T)
    fsin = -jnp.sin(theta)                                             # (M, T)
    # irfft reconstruction coefficients: DC (and Nyquist, if present) count once
    midx = jnp.arange(M)
    c = jnp.where((midx == 0) | ((T % 2 == 0) & (midx == T // 2)), 1.0, 2.0)
    icos = (c[None, :] / T) * jnp.cos(theta).T                         # (T, M)
    isin = -(c[None, :] / T) * jnp.sin(theta).T                        # (T, M)

    eye_i = jnp.eye(Cin, dtype=jnp.float32)
    eye_o = jnp.eye(Cout, dtype=jnp.float32)
    eye_m = jnp.eye(M, dtype=jnp.float32)

    # forward DFT operator: rows (re/im, mode, in_ch), cols (t, in_ch)
    F = jnp.stack([fcos, fsin], 0)                                     # (2, M, T)
    F_op = jnp.einsum('pmt,ij->pmitj', F, eye_i).reshape(2 * M * Cin, T * Cin)

    # complex multiply operator: rows (re/im, mode, out_ch), cols (re/im, mode, in_ch)
    wr = weights[..., 0]                                               # (Cin, Cout, M)
    wi = weights[..., 1]
    Wc = jnp.stack([jnp.stack([wr, -wi], 0), jnp.stack([wi, wr], 0)], 0)  # (2,2,Cin,Cout,M)
    W_op = jnp.einsum('qpiom,mn->qmopni', Wc, eye_m).reshape(2 * M * Cout, 2 * M * Cin)

    # inverse DFT operator: rows (t, out_ch), cols (re/im, mode, out_ch)
    I = jnp.stack([icos, isin], 0)                                     # (2, T, M)
    I_op = jnp.einsum('ptm,ou->topmu', I, eye_o).reshape(T * Cout, 2 * M * Cout)

    # Compose once (tiny matrices; HIGHEST precision so DC/Nyquist structure
    # survives exactly).
    hi = jax.lax.Precision.HIGHEST
    WF = jnp.dot(W_op, F_op, precision=hi)                             # (2M*Cout, T*Cin)
    C_op = jnp.dot(I_op, WF, precision=hi)                             # (T*Cout, T*Cin)
    if fold_residual:
        C_op = C_op + jnp.eye(T * Cin, dtype=jnp.float32)              # out = x + h
    return C_op


# --------------------------- pallas_call driver -------------------------------
def _timeconv_slab_call(x_mat, c_op, *, s_tile, allow_input_fusion):
    """x_mat: (T*Cin, S) f32 slab; c_op: (T*Cout, T*Cin). Returns (T*Cout, S)."""
    TCi, S = x_mat.shape
    TCo = c_op.shape[0]
    assert s_tile % 128 == 0, "s_tile must be a multiple of 128 (lane width)"

    # Lane tile: as big as possible for a mem-bound streaming kernel, but
    #   (a) capped so small S doesn't get a pointlessly huge block, and
    #   (b) capped at ~S/4 so the grid has >=4 steps when S allows it:
    #       both v7x TensorCores get work and each can still double-buffer.
    # VMEM (in+out, double buffered) ~ 2*2*(TCi*tile*4) = 4 MiB at tile=8192 —
    # well inside the default scoped VMEM on v5e / v6e / v7x.
    tile = min(s_tile, max(128, _round_up(-(-S // 4), 128)))
    grid = (pl.cdiv(S, tile),)

    cost = pl.CostEstimate(
        flops=2 * TCi * TCo * S,
        bytes_accessed=4 * ((TCi + TCo) * S + TCi * TCo),
        transcendentals=0)

    cp_kwargs = dict(dimension_semantics=("parallel",))
    if allow_input_fusion:
        # Experiment knob: let XLA fuse the producer of x_mat (the layout
        # transpose) into the pallas_call prologue instead of materializing it.
        cp_kwargs["allow_input_fusion"] = [True, False]

    return pl.pallas_call(
        timeconv_kernel,
        out_shape=jax.ShapeDtypeStruct((TCo, S), jnp.float32),
        grid_spec=pltpu.PrefetchScalarGridSpec(
            num_scalar_prefetch=0,
            grid=grid,
            in_specs=[
                pl.BlockSpec((TCi, tile), lambda j: (0, j)),
                pl.BlockSpec((TCo, TCi), lambda j: (0, 0)),   # VMEM-resident constant
            ],
            out_specs=pl.BlockSpec((TCo, tile), lambda j: (0, j)),
        ),
        compiler_params=pltpu.CompilerParams(**cp_kwargs),
        cost_estimate=cost,
    )(x_mat, c_op)


# ------------------------------- wrappers -------------------------------------
@functools.partial(jax.jit, static_argnames=("T", "s_tile"))
def timeconv_x_slab(x_mat, weights1, *, T, s_tile=8192):
    """Layout-native (preferred) entry point.

    x_mat: (T*Cin, N*D) float32 slab, rows = (time, channel) flattened.
    Returns (T*Cout, N*D).  No HBM layout passes — use this when the
    surrounding model carries activations in (T, C, N*D) layout.
    """
    c_op = build_composed_operator(weights1.astype(jnp.float32), T,
                                   fold_residual=True)
    return _timeconv_slab_call(x_mat.astype(jnp.float32), c_op,
                               s_tile=s_tile, allow_input_fusion=False)


@functools.partial(jax.jit, static_argnames=("s_tile", "allow_input_fusion"))
def timeconv_x(x, weights1, *, s_tile=8192, allow_input_fusion=False):
    """Module-interface entry point. x: (T, N, D, Cin); weights1: (Cin, Cout, M, 2)."""
    T, N, D, Cin = x.shape
    Cin_w, Cout, M, _ = weights1.shape
    assert Cin == Cin_w and Cin == Cout, "residual x + h requires in_ch == out_ch"

    c_op = build_composed_operator(weights1.astype(jnp.float32), T,
                                   fold_residual=True)                 # (T*Cout, T*Cin)
    S = N * D

    # TODO(synk): carry activations in (T, C, N*D) slab layout in the
    # surrounding model and call timeconv_x_slab directly — these two HBM
    # layout passes roughly triple the HBM traffic of this mem-bound op.
    x_mat = jnp.transpose(x.astype(jnp.float32), (0, 3, 1, 2)).reshape(T * Cin, S)

    out_mat = _timeconv_slab_call(x_mat, c_op, s_tile=s_tile,
                                  allow_input_fusion=allow_input_fusion)

    out = out_mat.reshape(T, Cout, N, D)
    return jnp.transpose(out, (0, 2, 3, 1)).astype(x.dtype)


# --------------------------- numpy reference ---------------------------------
def ref_forward(x, w, modes):
    T = x.shape[0]
    xf = np.fft.rfft(x.astype(np.float64), axis=0)                     # (T//2+1, N, D, Cin)
    wc = w[..., 0].astype(np.float64) + 1j * w[..., 1].astype(np.float64)
    out_ft = np.einsum('mndi,iom->mndo', xf[:modes], wc)
    h = np.fft.irfft(out_ft, n=T, axis=0)
    return (x.astype(np.float64) + h).astype(np.float32)


if __name__ == "__main__":
    key = jax.random.PRNGKey(0)
    k_x, k_w, k_x2, k_x3 = jax.random.split(key, 4)

    T, N, D = 8, 5, 3
    in_ch = out_ch = 4
    modes = 3

    x = jax.random.normal(k_x, (T, N, D, in_ch), dtype=jnp.float32)
    # nn.Parameter(0.1 * torch.rand(in_ch, out_ch, modes, 2)) -> deterministic synth init
    weights1 = 0.1 * jax.random.uniform(k_w, (in_ch, out_ch, modes, 2), dtype=jnp.float32)

    # Test 1: module interface, single grid step (S = 15).
    out = jax.block_until_ready(timeconv_x(x, weights1))
    ref = ref_forward(np.asarray(x), np.asarray(weights1), modes)
    # HIGHEST-precision matmul with the residual identity folded in: f32-accurate.
    np.testing.assert_allclose(np.asarray(out), ref, rtol=1e-4, atol=1e-5)

    # Test 1b: layout-native slab entry point gives the same result.
    x_slab = jnp.transpose(x, (0, 3, 1, 2)).reshape(T * in_ch, N * D)
    out_slab = jax.block_until_ready(timeconv_x_slab(x_slab, weights1, T=T))
    ref_slab = np.transpose(ref, (0, 3, 1, 2)).reshape(T * out_ch, N * D)
    np.testing.assert_allclose(np.asarray(out_slab), ref_slab, rtol=1e-4, atol=1e-5)

    # Test 2: multiple grid steps + ragged last block (S = 300, tile = 128).
    N2, D2 = 100, 3
    x2 = jax.random.normal(k_x2, (T, N2, D2, in_ch), dtype=jnp.float32)
    out2 = jax.block_until_ready(timeconv_x(x2, weights1, s_tile=128))
    ref2 = ref_forward(np.asarray(x2), np.asarray(weights1), modes)
    np.testing.assert_allclose(np.asarray(out2), ref2, rtol=1e-4, atol=1e-5)

    # Test 3: default tiling path, >=4 grid steps (S = 4096 -> tile 1024, grid 4).
    N3, D3 = 1024, 4
    x3 = jax.random.normal(k_x3, (T, N3, D3, in_ch), dtype=jnp.float32)
    out3 = jax.block_until_ready(timeconv_x(x3, weights1))
    ref3 = ref_forward(np.asarray(x3), np.asarray(weights1), modes)
    np.testing.assert_allclose(np.asarray(out3), ref3, rtol=1e-4, atol=1e-5)

    print("KERNEL_OK")
</pallas_src>

<mosaic_0001>
module attributes {stable_mosaic.version = 11 : i64} {
  func.func @timeconv_kernel(%arg0: i32, %arg1: memref<32x128xf32, #tpu.memory_space<vmem>>, %arg2: memref<32x32xf32, #tpu.memory_space<vmem>>, %arg3: memref<32x128xf32, #tpu.memory_space<vmem>>) attributes {dimension_semantics = [#tpu.dimension_semantics<parallel>], iteration_bounds = array<i64: 1>, scalar_prefetch = 0 : i64, scratch_operands = 0 : i64, tpu.core_type = #tpu.core_type<tc>, window_params = [{transform_indices = @transform_0, window_bounds = array<i64: 32, 128>}, {pipeline_mode = #tpu.pipeline_mode<synchronous>, transform_indices = @transform_1, window_bounds = array<i64: 32, 32>}, {transform_indices = @transform_2, window_bounds = array<i64: 32, 128>}]} {
    %c0 = arith.constant 0 : index
    %c0_0 = arith.constant 0 : index
    %0 = vector.load %arg2[%c0, %c0_0] : memref<32x32xf32, #tpu.memory_space<vmem>>, vector<32x32xf32>
    %c0_1 = arith.constant 0 : index
    %c0_2 = arith.constant 0 : index
    %1 = vector.load %arg1[%c0_1, %c0_2] : memref<32x128xf32, #tpu.memory_space<vmem>>, vector<32x128xf32>
    %cst = arith.constant dense<0.000000e+00> : vector<32x128xf32>
    %2 = tpu.matmul %0, %1, %cst {dimension_numbers = #tpu.dot_dimension_numbers<[1], [0], [0], [1], [0, 0, 1, 1], [], []>, precision = #tpu.contract_precision<fp32>} : vector<32x32xf32>, vector<32x128xf32>, vector<32x128xf32> -> vector<32x128xf32>
    %c0_3 = arith.constant 0 : index
    %c0_4 = arith.constant 0 : index
    %3 = vector.load %arg3[%c0_3, %c0_4] : memref<32x128xf32, #tpu.memory_space<vmem>>, vector<32x128xf32>
    tpu.vector_store %arg3[%c0_3, %c0_4], %2 {strides = array<i32>} : memref<32x128xf32, #tpu.memory_space<vmem>>, vector<32x128xf32>,
    return
  }
  func.func @transform_0(%arg0: i32) -> (i32, i32) {
    %c0_i32 = arith.constant 0 : i32
    %c0_i32_0 = arith.constant 0 : i32
    return %c0_i32, %arg0 : i32, i32
  }
  func.func @transform_1(%arg0: i32) -> (i32, i32) {
    %c0_i32 = arith.constant 0 : i32
    %c0_i32_0 = arith.constant 0 : i32
    %c0_i32_1 = arith.constant 0 : i32
    return %c0_i32, %c0_i32_0 : i32, i32
  }
  func.func @transform_2(%arg0: i32) -> (i32, i32) {
    %c0_i32 = arith.constant 0 : i32
    %c0_i32_0 = arith.constant 0 : i32
    return %c0_i32, %arg0 : i32, i32
  }
}

</mosaic_0001>

<bundles_post_ra>
// kernel: timeconv_x.1
= control target key start
LH: loop header
LB: loop body
LE: loop exit
PB: predicated region body
PF: predicated region fallthrough
CT: control target
= control target key end

     0   :  { %vm19_vm0 = vcmask 261120   ;;  %s969_s0 = inlined_call_operand.vmem [shape: f32[32,15], index: 0, kind: input, shape index: {}]   ;;  %s970_s1 = inlined_call_operand.vmem [shape: f32[32,32], index: 1, kind: input, shape index: {}]   ;;  %s971_s2 = inlined_call_operand.vmem [shape: f32[32,15], index: 2, kind: output, shape index: {}]  }
   0x1   :  { %v15_v0 = vld [vmem:[%s969_s0] sm:$0xff]  ;;  %v16_v1 = vld [vmem:[%s969_s0 + $0x8] sm:$0xff]  ;;  %v17_v2 = vld [vmem:[%s969_s0 + $0x10] sm:$0xff] }
   0x2   :  { %v33_v3 = vand.u32 4294901760, %v15_v0  ;;  %v36_v4 = vand.u32 4294901760, %v16_v1  ;;  %v18_v5 = vld [vmem:[%s969_s0 + $0x18] sm:$0xff]  ;;  %v39_v6 = vand.u32 4294901760, %v17_v2  ;;  %v11_v7 = vld [vmem:[%s970_s1] sm:$0xff]  ;;  %v12_v8 = vld [vmem:[%s970_s1 + $0x8] sm:$0xff] }
   0x3   :  { %v42_v9 = vand.u32 4294901760, %v18_v5  ;;  %v21_v10 = vsel %vm19_vm0, %v11_v7, 0  ;;  %v24_v11 = vsel %vm19_vm0, %v12_v8, 0  ;;  %v13_v12 = vld [vmem:[%s970_s1 + $0x10] sm:$0xff]  ;;  %v14_v13 = vld [vmem:[%s970_s1 + $0x18] sm:$0xff] }
   0x4   :  { %v895_v14 = vpack.c.bf16 %v36_v4, %v33_v3  ;;  %v897_v15 = vand.u32 4294901760, %v21_v10  ;;  %v899_v16 = vand.u32 4294901760, %v24_v11  ;;  %v143_v17 = vsub.f32 %v15_v0, %v33_v3 }
   0x5   :  { %v901_v18 = vpack.c.bf16 %v42_v9, %v39_v6  ;;  %v150_v19 = vsub.f32 %v16_v1, %v36_v4  ;;  %v27_v20 = vsel %vm19_vm0, %v13_v12, 0  ;;  %v30_v21 = vsel %vm19_vm0, %v14_v13, 0 }
   0x6   :  { %787 = vmatprep.subr.bf16.mxu1 %v895_v14  ;;  %811 = vmatprep.subr.bf16.mxu0 %v895_v14  ;;  %v908_v22 = vsub.f32 %v21_v10, %v897_v15  ;;  %v911_v23 = vsub.f32 %v24_v11, %v899_v16  ;;  %v144_v24 = vand.u32 4294901760, %v143_v17  ;;  %v913_v25 = vand.u32 4294901760, %v27_v20 }
   0x7   :  { %789 = vmatpush3.bf16.msra.mxu1 %v895_v14  ;;  %813 = vmatpush3.bf16.msra.mxu0 %v895_v14  ;;  %v151_v26 = vand.u32 4294901760, %v150_v19  ;;  %v917_v27 = vand.u32 4294901760, %v30_v21  ;;  %v157_v28 = vsub.f32 %v17_v2, %v39_v6  ;;  %v164_v29 = vsub.f32 %v18_v5, %v42_v9 }
   0x8   :  { %791 = vmatprep.subr.bf16.mxu1 %v901_v18  ;;  %815 = vmatprep.subr.bf16.mxu0 %v901_v18  ;;  %v103_v30 = vand.u32 4294901760, %v908_v22  ;;  %v113_v31 = vand.u32 4294901760, %v911_v23  ;;  %v145_v32 = vsub.f32 %v143_v17, %v144_v24  ;;  %v924_v33 = vsub.f32 %v27_v20, %v913_v25 }
   0x9   :  { %v152_v34 = vsub.f32 %v150_v19, %v151_v26  ;;  %v818_v35 = vpack.c.bf16 %v151_v26, %v144_v24  ;;  %v927_v36 = vsub.f32 %v30_v21, %v917_v27  ;;  %v158_v37 = vand.u32 4294901760, %v157_v28 }
   0xa   :  { %v104_v38 = vsub.f32 %v908_v22, %v103_v30  ;;  %752 = vmatprep.mubr.f32.mxu0 %v103_v30  ;;  %v114_v39 = vsub.f32 %v911_v23, %v113_v31  ;;  %v146_v40 = vand.u32 4294901760, %v145_v32  ;;  %v123_v41 = vand.u32 4294901760, %v924_v33 }
   0xb   :  { %793 = vmatpush3.bf16.msra.mxu1 %v901_v18  ;;  %817 = vmatpush3.bf16.msra.mxu0 %v901_v18  ;;  %v153_v42 = vand.u32 4294901760, %v152_v34  ;;  %v133_v43 = vand.u32 4294901760, %v927_v36  ;;  %v159_v44 = vsub.f32 %v157_v28, %v158_v37  ;;  %v165_v45 = vand.u32 4294901760, %v164_v29 }
   0xc   :  { %v105_v46 = vand.u32 4294901760, %v104_v38  ;;  %v115_v47 = vand.u32 4294901760, %v114_v39  ;;  %819 = vmatprep.subr.bf16.mxu0 %v818_v35  ;;  %v124_v48 = vsub.f32 %v924_v33, %v123_v41  ;;  %v802_v58 = vpack.c.bf16 %v150_v19, %v143_v17 }
   0xd   :  { %v794_v49 = vpack.c.bf16 %v153_v42, %v146_v40  ;;  %v134_v50 = vsub.f32 %v927_v36, %v133_v43  ;;  %v160_v51 = vand.u32 4294901760, %v159_v44  ;;  %v166_v52 = vsub.f32 %v164_v29, %v165_v45 }
   0xe   :  { %710 = vmatprep.mubr.f32.mxu1 %v105_v46  ;;  %753 = vmatmul.mubr.f32.vlgmr.msra.gmra.mrb[0].mxu0 %v113_v31  ;;  %v125_v53 = vand.u32 4294901760, %v124_v48  ;;  %v822_v54 = vpack.c.bf16 %v165_v45, %v158_v37  ;;  %v806_v59 = vpack.c.bf16 %v164_v29, %v157_v28 }
   0xf   :  { %711 = vmatmul.mubr.f32.vlgmr.msra.gmra.mrb[0].mxu1 %v115_v47  ;;  %795 = vmatprep.subr.bf16.mxu1 %v794_v49  ;;  %v135_v55 = vand.u32 4294901760, %v134_v50  ;;  %v167_v56 = vand.u32 4294901760, %v166_v52 }
  0x10   :  { %797 = vmatpush3.bf16.msra.mxu1 %v794_v49  ;;  %821 = vmatpush3.bf16.msra.mxu0 %v818_v35 }
  0x11   :  { %713 = vmatprep.mubr.f32.mxu1 %v125_v53  ;;  %755 = vmatprep.mubr.f32.mxu0 %v123_v41  ;;  %v798_v57 = vpack.c.bf16 %v167_v56, %v160_v51 }
  0x12   :  { %756 = vmatmul.mubr.f32.gmra.mrb[2].mxu0 %v133_v43  ;;  %823 = vmatprep.subr.bf16.mxu0 %v822_v54 }
  0x13   :  { %714 = vmatmul.mubr.f32.gmra.mrb[2].mxu1 %v135_v55  ;;  %799 = vmatprep.subr.bf16.mxu1 %v798_v57 }
  0x14   :  { %801 = vmatpush3.bf16.msra.mxu1 %v798_v57  ;;  %825 = vmatpush3.bf16.msra.mxu0 %v822_v54 }
  0x15   :  { %724 = vmatprep.mubr.f32.mxu1 %v897_v15  ;;  %766 = vmatprep.mubr.f32.mxu0 %v897_v15 }
  0x16   :  { %803 = vmatprep.subr.bf16.mxu1 %v802_v58  ;;  %827 = vmatprep.subr.bf16.mxu0 %v895_v14 }
  0x17   :  { %725 = vmatmul.mubr.f32.vlgmr.msra.gmra.mrb[0].mxu1 %v899_v16  ;;  %767 = vmatmul.mubr.f32.vlgmr.msra.gmra.mrb[0].mxu0 %v899_v16 }
  0x18   :  { %805 = vmatpush3.bf16.msra.mxu1 %v802_v58  ;;  %829 = vmatpush3.bf16.msra.mxu0 %v895_v14 }
  0x19   :  { %727 = vmatprep.mubr.f32.mxu1 %v913_v25  ;;  %769 = vmatprep.mubr.f32.mxu0 %v913_v25 }
  0x1a   :  { %807 = vmatprep.subr.bf16.mxu1 %v806_v59  ;;  %831 = vmatprep.subr.bf16.mxu0 %v901_v18 }
  0x1b   :  { %728 = vmatmul.mubr.f32.gmra.mrb[2].mxu1 %v917_v27  ;;  %770 = vmatmul.mubr.f32.gmra.mrb[2].mxu0 %v917_v27 }
  0x1c   :  { %809 = vmatpush3.bf16.msra.mxu1 %v806_v59  ;;  %833 = vmatpush3.bf16.msra.mxu0 %v901_v18 }
  0x1d   :  { %738 = vmatprep.mubr.f32.mxu1 %v908_v22  ;;  %780 = vmatprep.mubr.f32.mxu0 %v897_v15 }
  0x1f   :  { %739 = vmatmul.mubr.f32.vlgmr.msra.gmra.mrb[0].mxu1 %v911_v23  ;;  %781 = vmatmul.mubr.f32.vlgmr.msra.gmra.mrb[0].mxu0 %v899_v16 }
  0x20   :  { %741 = vmatprep.mubr.f32.mxu1 %v924_v33  ;;  %783 = vmatprep.mubr.f32.mxu0 %v913_v25 }
  0x23   :  { %742 = vmatmul.mubr.f32.gmra.mrb[2].mxu1 %v927_v36  ;;  %784 = vmatmul.mubr.f32.gmra.mrb[2].mxu0 %v917_v27 }
  0xf2   :  { %v740_v60 = vpop.f32.mrb[0].mxu1  ;;  %v782_v61 = vpop.f32.mrb[0].mxu0 }
  0xf3   :  { %v834_v62 = vadd.f32 %v782_v61, %v740_v60  ;;  %v326_v63 = vpop.f32.mrb[1].mxu1  ;;  %v624_v0 = vpop.f32.mrb[1].mxu0 }
  0xf4   :  { %v835_v1 = vadd.f32 %v624_v0, %v326_v63 }
  0xf5   :  { %647 = vst [vmem:[%s971_s2 + $0x8] sm:$0xff] %v834_v62 }
  0xf6   :  { %646 = vst [vmem:[%s971_s2] sm:$0xff] %v835_v1  ;;  %v743_v2 = vpop.f32.mrb[2].mxu1  ;;  %v785_v3 = vpop.f32.mrb[2].mxu0 }
  0xf7   :  { %v836_v4 = vadd.f32 %v785_v3, %v743_v2  ;;  %v340_v5 = vpop.f32.mrb[3].mxu1  ;;  %v636_v6 = vpop.f32.mrb[3].mxu0 }
  0xf8   :  { %v837_v7 = vadd.f32 %v636_v6, %v340_v5 }
  0xf9   :  { %649 = vst [vmem:[%s971_s2 + $0x18] sm:$0xff] %v836_v4 }
  0xfa   :  { %648 = vst [vmem:[%s971_s2 + $0x10] sm:$0xff] %v837_v7 }

</bundles_post_ra>
